<compile_context>
chip_gen: v6e
topology: v6e:2x2x1
jax: 0.10.0
libtpu: 0.0.40
codegen_flags: <defaults>
</compile_context>

<pallas_src>
import functools

import jax
import jax.numpy as jnp
from jax.experimental import pallas as pl
from jax.experimental.pallas import tpu as pltpu


def _round_up(x, m):
    return ((x + m - 1) // m) * m


def _wide_deep_kernel(apply_sigmoid, num_features,
                      wide_ref,
                      w_emb_ref, b_emb_ref,
                      w_d1_ref, b_d1_ref,
                      w_d2_ref, b_d2_ref,
                      w_dec_h2_ref,
                      out_ref):
    f32 = jnp.float32
    F = num_features

    wide = wide_ref[...]                              # (Nw, Bt), rows = [uc|city|cat]

    # --- fused embedding linears + wide half of the final decoder -----------
    # w_emb rows 0:3F are block-diag [w_uc^T | w_city^T | w_cat^T]; row 3F is
    # the wide part of w_dec; b_emb row 3F carries b_dec.
    emb = jnp.dot(w_emb_ref[...], wide,
                  preferred_element_type=f32) + b_emb_ref[...]       # (3F+1, Bt)
    e_uc = emb[0:F, :]
    e_city = emb[F:2 * F, :]
    e_cat = emb[2 * F:3 * F, :]
    x_wide = emb[3 * F:3 * F + 1, :]                  # wide decoder dot + b_dec

    # --- pairwise interactions -> deep-decoder input (vreg-aligned sublanes) --
    deep_in = jnp.concatenate(
        [e_uc * e_city, e_uc * e_cat, e_city * e_cat], axis=0)       # (3F, Bt)

    # --- deep decoder: Linear(3F->H1)+tanh, Linear(H1->H2)+tanh --------------
    h1 = jnp.tanh(jnp.dot(w_d1_ref[...], deep_in,
                          preferred_element_type=f32) + b_d1_ref[...])   # (H1, Bt)
    h2 = jnp.tanh(jnp.dot(w_d2_ref[...], h1,
                          preferred_element_type=f32) + b_d2_ref[...])   # (H2, Bt)

    # --- deep half of the final decoder: VPU mul + tiny sublane reduction ----
    x = x_wide + jnp.sum(h2 * w_dec_h2_ref[...], axis=0, keepdims=True)  # (1, Bt)

    if apply_sigmoid:
        x = jax.nn.sigmoid(x)
    out_ref[...] = x.astype(out_ref.dtype)            # lane-dense (1, Bt) store


def wide_deep_forward(uc, city, cat, params, methods="classification",
                      b_tile=2048):
    """Run the wide&deep forward pass as a single batch-gridded Pallas kernel
    with the batch mapped to the lane axis."""
    B = uc.shape[0]
    apply_sigmoid = (methods != "regression")

    Nu, Nc, Ng = uc.shape[1], city.shape[1], cat.shape[1]
    Nw = Nu + Nc + Ng
    F = params["w_uc"].shape[1]
    H1 = params["w_d1"].shape[1]
    H2 = params["w_d2"].shape[1]

    # --- batch tile selection -------------------------------------------------
    # lanes come in 128s; target >=2 grid steps (both v7x TCs) for mid batches;
    # cap so double-buffered (Nw, B_TILE) tiles stay well inside v5e VMEM.
    half = _round_up(pl.cdiv(B, 2), 128)
    B_TILE = max(128, min(b_tile, half))
    B_pad = _round_up(B, B_TILE)

    # --- host-side packing (batch on the lane axis) ---------------------------
    # TODO(synk): callers doing many forward passes should build / cache wide_T
    # (optionally bf16-cast) once outside this function so the kernel's input
    # stream is the only full-batch HBM pass.
    wide_T = jnp.concatenate([uc.T, city.T, cat.T], axis=0).astype(jnp.float32)
    if B_pad != B:
        wide_T = jnp.pad(wide_T, ((0, 0), (0, B_pad - B)))

    # fused weight: block-diagonal embedding weights + one dense decoder row;
    # fused bias carries b_dec in its last row.
    w_emb = jnp.zeros((3 * F + 1, Nw), jnp.float32)
    w_emb = w_emb.at[0:F, 0:Nu].set(params["w_uc"].T)
    w_emb = w_emb.at[F:2 * F, Nu:Nu + Nc].set(params["w_city"].T)
    w_emb = w_emb.at[2 * F:3 * F, Nu + Nc:Nw].set(params["w_cat"].T)
    w_emb = w_emb.at[3 * F, :].set(params["w_dec"][:Nw, 0])
    b_emb = jnp.concatenate(
        [params["b_uc"], params["b_city"], params["b_cat"], params["b_dec"]],
        axis=-1).T                                     # (3F+1, 1)

    w_d1 = params["w_d1"].T                            # (H1, 3F)
    b_d1 = params["b_d1"].T                            # (H1, 1)
    w_d2 = params["w_d2"].T                            # (H2, H1)
    b_d2 = params["b_d2"].T                            # (H2, 1)
    w_dec_h2 = params["w_dec"][Nw:, :]                 # (H2, 1)

    grid = (B_pad // B_TILE,)

    def resident(shape):
        # full-array block, same block every grid step (weights stay in VMEM)
        return pl.BlockSpec(shape, lambda i: (0, 0))

    cost = pl.CostEstimate(
        flops=2 * B_pad * (Nw * (3 * F + 1) + 3 * F * H1 + H1 * H2 + H2),
        transcendentals=B_pad * (H1 + H2 + (1 if apply_sigmoid else 0)),
        bytes_accessed=4 * (B_pad * (Nw + 1)
                            + (3 * F + 1) * (Nw + 1)
                            + H1 * (3 * F + 1) + H2 * (H1 + 2)),
    )

    out = pl.pallas_call(
        functools.partial(_wide_deep_kernel, apply_sigmoid, F),
        out_shape=jax.ShapeDtypeStruct((1, B_pad), jnp.float32),
        grid=grid,
        in_specs=[
            pl.BlockSpec((Nw, B_TILE), lambda i: (0, i)),   # batch-tiled input
            resident(w_emb.shape), resident(b_emb.shape),
            resident(w_d1.shape), resident(b_d1.shape),
            resident(w_d2.shape), resident(b_d2.shape),
            resident(w_dec_h2.shape),
        ],
        out_specs=pl.BlockSpec((1, B_TILE), lambda i: (0, i)),
        compiler_params=pltpu.CompilerParams(
            dimension_semantics=("parallel",)),
        cost_estimate=cost,
    )(wide_T, w_emb, b_emb, w_d1, b_d1, w_d2, b_d2, w_dec_h2)

    return out[0, :B][:, None]


def init_params(key, num_user_compliment, num_business_city,
                num_business_category, num_features):
    """Deterministic synthetic parameters (PyTorch Linear shapes, pre-transposed
    to (in, out); biases stored as (1, out) rows)."""
    num_deep_decoder = 3 * num_features
    h1 = int(round(num_deep_decoder / 2, 0))
    h2 = int(round(num_deep_decoder / 4, 0))
    num_decoder = (num_user_compliment + num_business_city
                   + num_business_category + h2)

    keys = jax.random.split(key, 12)

    def lin(kw, kb, n_in, n_out):
        w = jax.random.normal(kw, (n_in, n_out), jnp.float32) * 0.1
        b = jax.random.normal(kb, (1, n_out), jnp.float32) * 0.1
        return w, b

    w_uc, b_uc = lin(keys[0], keys[1], num_user_compliment, num_features)
    w_city, b_city = lin(keys[2], keys[3], num_business_city, num_features)
    w_cat, b_cat = lin(keys[4], keys[5], num_business_category, num_features)
    w_d1, b_d1 = lin(keys[6], keys[7], num_deep_decoder, h1)
    w_d2, b_d2 = lin(keys[8], keys[9], h1, h2)
    w_dec, b_dec = lin(keys[10], keys[11], num_decoder, 1)

    # TODO(synk): user_compliment_weight_linear / business_*_weight_linear from
    # __init__ are never used in forward(); intentionally omitted.

    return dict(w_uc=w_uc, b_uc=b_uc, w_city=w_city, b_city=b_city,
                w_cat=w_cat, b_cat=b_cat, w_d1=w_d1, b_d1=b_d1,
                w_d2=w_d2, b_d2=b_d2, w_dec=w_dec, b_dec=b_dec)


def reference_forward(uc, city, cat, p, methods="classification"):
    """Plain-JAX reference mirroring the PyTorch forward exactly."""
    e_uc = uc @ p["w_uc"] + p["b_uc"]
    e_city = city @ p["w_city"] + p["b_city"]
    e_cat = cat @ p["w_cat"] + p["b_cat"]
    deep_in = jnp.concatenate(
        [e_uc * e_city, e_uc * e_cat, e_city * e_cat], axis=-1)
    h1 = jnp.tanh(deep_in @ p["w_d1"] + p["b_d1"])
    h2 = jnp.tanh(h1 @ p["w_d2"] + p["b_d2"])
    wide = jnp.concatenate([uc, city, cat], axis=1)
    allx = jnp.concatenate([wide, h2], axis=1)
    x = allx @ p["w_dec"] + p["b_dec"]
    if methods == "regression":
        return x
    return jax.nn.sigmoid(x)


if __name__ == "__main__":
    # small, deterministic problem
    num_user_compliment = 12
    num_business_city = 10
    num_business_category = 14
    num_features = 8

    key = jax.random.PRNGKey(0)
    k_uc, k_city, k_cat, k_params = jax.random.split(key, 4)

    params = init_params(k_params, num_user_compliment, num_business_city,
                         num_business_category, num_features)

    # --- test 1: tiny batch (single 128-lane tile, padded 4 -> 128) ----------
    batch = 4
    uc = jax.random.normal(k_uc, (batch, num_user_compliment), jnp.float32)
    city = jax.random.normal(k_city, (batch, num_business_city), jnp.float32)
    cat = jax.random.normal(k_cat, (batch, num_business_category), jnp.float32)

    out = jax.block_until_ready(
        wide_deep_forward(uc, city, cat, params, methods="classification"))
    ref = reference_forward(uc, city, cat, params, methods="classification")
    assert out.shape == (batch, 1)
    assert jnp.allclose(out, ref, atol=2e-5, rtol=2e-5), (out, ref)

    # regression head (no sigmoid)
    out_r = jax.block_until_ready(
        wide_deep_forward(uc, city, cat, params, methods="regression"))
    ref_r = reference_forward(uc, city, cat, params, methods="regression")
    assert jnp.allclose(out_r, ref_r, atol=2e-5, rtol=2e-5)

    # --- test 2: multi-tile grid with lane padding (300 rows, 128-lane tiles) -
    batch2 = 300
    k_uc2, k_city2, k_cat2 = jax.random.split(jax.random.PRNGKey(1), 3)
    uc2 = jax.random.normal(k_uc2, (batch2, num_user_compliment), jnp.float32)
    city2 = jax.random.normal(k_city2, (batch2, num_business_city), jnp.float32)
    cat2 = jax.random.normal(k_cat2, (batch2, num_business_category), jnp.float32)

    out2 = jax.block_until_ready(
        wide_deep_forward(uc2, city2, cat2, params, b_tile=128))
    ref2 = reference_forward(uc2, city2, cat2, params)
    assert out2.shape == (batch2, 1)
    assert jnp.allclose(out2, ref2, atol=2e-5, rtol=2e-5)

    print("KERNEL_OK")
</pallas_src>

<mosaic_0001>
module attributes {stable_mosaic.version = 11 : i64} {
  func.func @_wide_deep_kernel(%arg0: i32, %arg1: memref<36x128xf32, #tpu.memory_space<vmem>>, %arg2: memref<25x36xf32, #tpu.memory_space<vmem>>, %arg3: memref<25x1xf32, #tpu.memory_space<vmem>>, %arg4: memref<12x24xf32, #tpu.memory_space<vmem>>, %arg5: memref<12x1xf32, #tpu.memory_space<vmem>>, %arg6: memref<6x12xf32, #tpu.memory_space<vmem>>, %arg7: memref<6x1xf32, #tpu.memory_space<vmem>>, %arg8: memref<6x1xf32, #tpu.memory_space<vmem>>, %arg9: memref<1x128xf32, #tpu.memory_space<vmem>>) attributes {dimension_semantics = [#tpu.dimension_semantics<parallel>], iteration_bounds = array<i64: 1>, scalar_prefetch = 0 : i64, scratch_operands = 0 : i64, tpu.core_type = #tpu.core_type<tc>, window_params = [{transform_indices = @transform_0, window_bounds = array<i64: 36, 128>}, {pipeline_mode = #tpu.pipeline_mode<synchronous>, transform_indices = @transform_1, window_bounds = array<i64: 25, 36>}, {pipeline_mode = #tpu.pipeline_mode<synchronous>, transform_indices = @transform_2, window_bounds = array<i64: 25, 1>}, {pipeline_mode = #tpu.pipeline_mode<synchronous>, transform_indices = @transform_3, window_bounds = array<i64: 12, 24>}, {pipeline_mode = #tpu.pipeline_mode<synchronous>, transform_indices = @transform_4, window_bounds = array<i64: 12, 1>}, {pipeline_mode = #tpu.pipeline_mode<synchronous>, transform_indices = @transform_5, window_bounds = array<i64: 6, 12>}, {pipeline_mode = #tpu.pipeline_mode<synchronous>, transform_indices = @transform_6, window_bounds = array<i64: 6, 1>}, {pipeline_mode = #tpu.pipeline_mode<synchronous>, transform_indices = @transform_7, window_bounds = array<i64: 6, 1>}, {transform_indices = @transform_8, window_bounds = array<i64: 1, 128>}]} {
    %c0 = arith.constant 0 : index
    %c0_0 = arith.constant 0 : index
    %0 = vector.load %arg1[%c0, %c0_0] : memref<36x128xf32, #tpu.memory_space<vmem>>, vector<36x128xf32>
    %c0_1 = arith.constant 0 : index
    %c0_2 = arith.constant 0 : index
    %1 = vector.load %arg2[%c0_1, %c0_2] : memref<25x36xf32, #tpu.memory_space<vmem>>, vector<25x36xf32>
    %cst = arith.constant dense<0.000000e+00> : vector<25x128xf32>
    %2 = tpu.matmul %1, %0, %cst {dimension_numbers = #tpu.dot_dimension_numbers<[1], [0], [0], [1], [0, 0, 1, 1], [], []>} : vector<25x36xf32>, vector<36x128xf32>, vector<25x128xf32> -> vector<25x128xf32>
    %c0_3 = arith.constant 0 : index
    %c0_4 = arith.constant 0 : index
    %3 = vector.load %arg3[%c0_3, %c0_4] : memref<25x1xf32, #tpu.memory_space<vmem>>, vector<25x1xf32>
    %4 = vector.broadcast %3 : vector<25x1xf32> to vector<25x128xf32>
    %5 = arith.addf %2, %4 : vector<25x128xf32>
    %6 = vector.extract_strided_slice %5 {offsets = [0, 0], sizes = [8, 128], strides = [1, 1]} : vector<25x128xf32> to vector<8x128xf32>
    %7 = vector.extract_strided_slice %5 {offsets = [8, 0], sizes = [8, 128], strides = [1, 1]} : vector<25x128xf32> to vector<8x128xf32>
    %8 = vector.extract_strided_slice %5 {offsets = [16, 0], sizes = [8, 128], strides = [1, 1]} : vector<25x128xf32> to vector<8x128xf32>
    %9 = vector.extract_strided_slice %5 {offsets = [24, 0], sizes = [1, 128], strides = [1, 1]} : vector<25x128xf32> to vector<1x128xf32>
    %10 = arith.mulf %6, %7 : vector<8x128xf32>
    %11 = arith.mulf %6, %8 : vector<8x128xf32>
    %12 = arith.mulf %7, %8 : vector<8x128xf32>
    %13 = tpu.concatenate %10, %11, %12 in 0 : vector<8x128xf32>, vector<8x128xf32>, vector<8x128xf32> -> vector<24x128xf32>
    %c0_5 = arith.constant 0 : index
    %c0_6 = arith.constant 0 : index
    %14 = vector.load %arg4[%c0_5, %c0_6] : memref<12x24xf32, #tpu.memory_space<vmem>>, vector<12x24xf32>
    %cst_7 = arith.constant dense<0.000000e+00> : vector<12x128xf32>
    %15 = tpu.matmul %14, %13, %cst_7 {dimension_numbers = #tpu.dot_dimension_numbers<[1], [0], [0], [1], [0, 0, 1, 1], [], []>} : vector<12x24xf32>, vector<24x128xf32>, vector<12x128xf32> -> vector<12x128xf32>
    %c0_8 = arith.constant 0 : index
    %c0_9 = arith.constant 0 : index
    %16 = vector.load %arg5[%c0_8, %c0_9] : memref<12x1xf32, #tpu.memory_space<vmem>>, vector<12x1xf32>
    %17 = vector.broadcast %16 : vector<12x1xf32> to vector<12x128xf32>
    %18 = arith.addf %15, %17 : vector<12x128xf32>
    %19 = math.tanh %18 : vector<12x128xf32>
    %c0_10 = arith.constant 0 : index
    %c0_11 = arith.constant 0 : index
    %20 = vector.load %arg6[%c0_10, %c0_11] : memref<6x12xf32, #tpu.memory_space<vmem>>, vector<6x12xf32>
    %cst_12 = arith.constant dense<0.000000e+00> : vector<6x128xf32>
    %21 = tpu.matmul %20, %19, %cst_12 {dimension_numbers = #tpu.dot_dimension_numbers<[1], [0], [0], [1], [0, 0, 1, 1], [], []>} : vector<6x12xf32>, vector<12x128xf32>, vector<6x128xf32> -> vector<6x128xf32>
    %c0_13 = arith.constant 0 : index
    %c0_14 = arith.constant 0 : index
    %22 = vector.load %arg7[%c0_13, %c0_14] : memref<6x1xf32, #tpu.memory_space<vmem>>, vector<6x1xf32>
    %23 = vector.broadcast %22 : vector<6x1xf32> to vector<6x128xf32>
    %24 = arith.addf %21, %23 : vector<6x128xf32>
    %25 = math.tanh %24 : vector<6x128xf32>
    %c0_15 = arith.constant 0 : index
    %c0_16 = arith.constant 0 : index
    %26 = vector.load %arg8[%c0_15, %c0_16] : memref<6x1xf32, #tpu.memory_space<vmem>>, vector<6x1xf32>
    %27 = vector.broadcast %26 : vector<6x1xf32> to vector<6x128xf32>
    %28 = arith.mulf %25, %27 : vector<6x128xf32>
    %cst_17 = arith.constant dense<0.000000e+00> : vector<128xf32>
    %29 = vector.multi_reduction <add>, %28, %cst_17 [0] : vector<6x128xf32> to vector<128xf32>
    %30 = vector.shape_cast %29 : vector<128xf32> to vector<1x128xf32>
    %31 = arith.addf %9, %30 : vector<1x128xf32>
    %32 = arith.negf %31 : vector<1x128xf32>
    %33 = math.exp %32 : vector<1x128xf32>
    %cst_18 = arith.constant 1.000000e+00 : f32
    %34 = vector.broadcast %cst_18 : f32 to vector<1x128xf32>
    %35 = arith.addf %34, %33 : vector<1x128xf32>
    %36 = arith.divf %34, %35 : vector<1x128xf32>
    %c0_19 = arith.constant 0 : index
    %c0_20 = arith.constant 0 : index
    %37 = vector.load %arg9[%c0_19, %c0_20] : memref<1x128xf32, #tpu.memory_space<vmem>>, vector<1x128xf32>
    tpu.vector_store %arg9[%c0_19, %c0_20], %36 {strides = array<i32>} : memref<1x128xf32, #tpu.memory_space<vmem>>, vector<1x128xf32>,
    return
  }
  func.func @transform_0(%arg0: i32) -> (i32, i32) {
    %c0_i32 = arith.constant 0 : i32
    %c0_i32_0 = arith.constant 0 : i32
    return %c0_i32, %arg0 : i32, i32
  }
  func.func @transform_1(%arg0: i32) -> (i32, i32) {
    %c0_i32 = arith.constant 0 : i32
    %c0_i32_0 = arith.constant 0 : i32
    %c0_i32_1 = arith.constant 0 : i32
    return %c0_i32, %c0_i32_0 : i32, i32
  }
  func.func @transform_2(%arg0: i32) -> (i32, i32) {
    %c0_i32 = arith.constant 0 : i32
    %c0_i32_0 = arith.constant 0 : i32
    %c0_i32_1 = arith.constant 0 : i32
    return %c0_i32, %c0_i32_0 : i32, i32
  }
  func.func @transform_3(%arg0: i32) -> (i32, i32) {
    %c0_i32 = arith.constant 0 : i32
    %c0_i32_0 = arith.constant 0 : i32
    %c0_i32_1 = arith.constant 0 : i32
    return %c0_i32, %c0_i32_0 : i32, i32
  }
  func.func @transform_4(%arg0: i32) -> (i32, i32) {
    %c0_i32 = arith.constant 0 : i32
    %c0_i32_0 = arith.constant 0 : i32
    %c0_i32_1 = arith.constant 0 : i32
    return %c0_i32, %c0_i32_0 : i32, i32
  }
  func.func @transform_5(%arg0: i32) -> (i32, i32) {
    %c0_i32 = arith.constant 0 : i32
    %c0_i32_0 = arith.constant 0 : i32
    %c0_i32_1 = arith.constant 0 : i32
    return %c0_i32, %c0_i32_0 : i32, i32
  }
  func.func @transform_6(%arg0: i32) -> (i32, i32) {
    %c0_i32 = arith.constant 0 : i32
    %c0_i32_0 = arith.constant 0 : i32
    %c0_i32_1 = arith.constant 0 : i32
    return %c0_i32, %c0_i32_0 : i32, i32
  }
  func.func @transform_7(%arg0: i32) -> (i32, i32) {
    %c0_i32 = arith.constant 0 : i32
    %c0_i32_0 = arith.constant 0 : i32
    %c0_i32_1 = arith.constant 0 : i32
    return %c0_i32, %c0_i32_0 : i32, i32
  }
  func.func @transform_8(%arg0: i32) -> (i32, i32) {
    %c0_i32 = arith.constant 0 : i32
    %c0_i32_0 = arith.constant 0 : i32
    return %c0_i32, %arg0 : i32, i32
  }
}

</mosaic_0001>

<bundles_post_ra>
// kernel: tpu_custom_call.1
= control target key start
LH: loop header
LB: loop body
LE: loop exit
PB: predicated region body
PF: predicated region fallthrough
CT: control target
= control target key end

     0   :  { %13 = vsyncpa [#allocation3], 0  ;;  %s640_s0 = inlined_call_operand.vmem [shape: f32[36,128], index: 0, kind: input, shape index: {}]   ;;  %s641_s1 = inlined_call_operand.hbm [shape: f32[25,36], index: 1, kind: input, shape index: {}]   ;;  %s642_s2 = inlined_call_operand.vmem [shape: f32[25,1], index: 2, kind: input, shape index: {}]   ;;  %s643_s3 = inlined_call_operand.vmem [shape: f32[12,24], index: 3, kind: input, shape index: {}]   ;;  %s644_s4 = inlined_call_operand.vmem [shape: f32[12,1], index: 4, kind: input, shape index: {}]   ;;  %s645_s5 = inlined_call_operand.vmem [shape: f32[6,12], index: 5, kind: input, shape index: {}]   ;;  %s646_s6 = inlined_call_operand.vmem [shape: f32[6,1], index: 6, kind: input, shape index: {}]   ;;  %s647_s7 = inlined_call_operand.vmem [shape: f32[6,1], index: 7, kind: input, shape index: {}]   ;;  %s648_s8 = inlined_call_operand.hbm [shape: f32[1,128], index: 8, kind: output, shape index: {}]  }
   0x1   :  { %14 = vsyncpa [#allocation4], 0  ;;  %s525_s27 = smov [#allocation2]  }
   0x2   :  { %s22_s28 = sshll.u32 %s525_s27, 4  ;;  %s23_s28 = int_to_ptr.vmem [resolvable:$true] %s22_s28 }
   0x3   :  { %s489_s29 = scalar_lea.vmem %s23_s28, 512  ;;  %p494_p1 = scmp.lt.s32.totalorder %s23_s28, %s23_s28 }
   0x4   :  { %p490_p0 = scmp.ne.s32.totalorder %s23_s28, %s489_s29  ;;  %p495_p2 = scmp.lt.s32.totalorder %s489_s29, %s489_s29 }
   0x6   :  { %p496_p3 = por %p495_p2, %p494_p1 }
   0x8   :  { %p497_p4 = pnand %p496_p3, %p490_p0 }
   0xa   :  { %500 = shalt.err (!%p497_p4)
}
   0xb   :  { %s526_s30 = smov 128   ;;  %s527_s9 = smov 8  }
   0xc   :  { %28 = dma.hbm_to_vmem [thread:$0]  %s641_s1, 512, %s23_s28, [#allocation3], %s526_s30, %s526_s30, %s527_s9  }
   0xd   :  { %521 = dma.done.wait [#allocation3], 512  }
   0xe   :  { %522 = vsyncadd [#allocation3], 4294966784  ;;  %v528_v0 = vmov 0   ;;  %vm90_vm0 = vcmask 1043456   ;;  %vm77_vm1 = vcmask 293888   ;;  %v47_v2 = vld [vmem:[%s640_s0 + $0x18] sm:$0xff] }
   0xf   :  { %469 = vset.pattern.permute.xlu0 %v528_v0  ;;  %470 = vset.pattern.permute.xlu1 %v528_v0  ;;  %v48_v1 = vld [vmem:[%s640_s0 + $0x20] sm:$0xf]  ;;  %v46_v4 = vld [vmem:[%s640_s0 + $0x10] sm:$0xff]  ;;  %v54_v5 = vld [vmem:[%s642_s2 + $0x8] sm:$0xff]  ;;  %vm196_vm2 = vcmask 195584   ;;  %v529_v33 = vmov 0.0  }
  0x10   :  { %430 = vmatprep.subr.msk.mxu0 %vm90_vm0, %v48_v1  ;;  %v49_v3 = vld [vmem:[#allocation2] sm:$0xff]  ;;  %v45_v7 = vld [vmem:[%s640_s0 + $0x8] sm:$0xff]  ;;  %64 = vperm.xlu0 %469, %v54_v5   ;;  %v55_v8 = vld [vmem:[%s642_s2 + $0x10] sm:$0xff]  ;;  %vm530_vm3 = vmmov 0   ;;  %vm287_vm4 = vcmask 97280   ;;  %vm372_vm5 = vcmask 1045504  }
  0x11   :  { %431 = vmatpush3.msk.msra.mxu0 %vm90_vm0, %v48_v1  ;;  %440 = vmatprep.mubr.msk.f32.mxu0 %vm77_vm1, %v49_v3  ;;  %v53_v6 = vld [vmem:[%s642_s2] sm:$0xff]  ;;  %v185_v10 = vld [vmem:[%s644_s4 + $0x8] sm:$0xf]  ;;  %v51_v12 = vld [vmem:[#allocation2 + $0x10] sm:$0xff] }
  0x12   :  { %432 = vmatprep.subr.mxu0 %v47_v2  ;;  %59 = vperm.xlu1 %470, %v53_v6   ;;  %v44_v9 = vld [vmem:[%s640_s0] sm:$0xff]  ;;  %v50_v11 = vld [vmem:[#allocation2 + $0x8] sm:$0xff]  ;;  %v52_v15 = vld [vmem:[#allocation2 + $0x18] sm:$0x1] }
  0x13   :  { %433 = vmatpush3.msra.mxu0 %v47_v2  ;;  %v184_v13 = vld [vmem:[%s644_s4] sm:$0xff]  ;;  %v56_v17 = vld [vmem:[%s642_s2 + $0x18] sm:$0x1]  ;;  %v183_v32 = vld [vmem:[%s643_s3 + $0x8] sm:$0xf] }
  0x14   :  { %434 = vmatprep.subr.mxu0 %v46_v4  ;;  %69 = vperm.xlu0 %469, %v55_v8   ;;  %v281_v14 = vld [vmem:[%s646_s6] sm:$0x3f] }
  0x15   :  { %435 = vmatpush3.msra.mxu0 %v46_v4  ;;  %v365_v16 = vld [vmem:[%s647_s7] sm:$0x3f] }
  0x16   :  { %436 = vmatprep.subr.mxu0 %v45_v7  ;;  %193 = vperm.xlu1 %470, %v185_v10   ;;  %v182_v18 = vld [vmem:[%s643_s3] sm:$0xff] }
  0x17   :  { %437 = vmatpush3.msra.mxu0 %v45_v7  ;;  %452 = vmatprep.mubr.msk.f32.mxu1 %vm196_vm2, %v182_v18  ;;  %v280_v41 = vld [vmem:[%s645_s5] sm:$0x3f]  ;;  %s531_s5 = smov [#allocation5]  }
  0x18   :  { %438 = vmatprep.subr.mxu0 %v44_v9  ;;  %188 = vperm.xlu0 %469, %v184_v13   ;;  %s394_s15 = sshll.u32 %s531_s5, 4  ;;  %s395_s15 = int_to_ptr.vmem [resolvable:$true] %s394_s15 }
  0x19   :  { %439 = vmatpush3.msra.mxu0 %v44_v9  ;;  %s501_s1 = scalar_lea.vmem %s395_s15, 16  ;;  %s505_s16 = scalar_lea.vmem %s395_s15, 32 }
  0x1a   :  { %441 = vmatmul.mubr.msk.f32.vlgmr.msra.gmra.mxu0 %vm77_vm1, %v50_v11  ;;  %284 = vperm.xlu1 %470, %v281_v14   ;;  %p502_p5 = scmp.ne.s32.totalorder %s395_s15, %s501_s1  ;;  %p506_p6 = scmp.lt.s32.totalorder %s395_s15, %s395_s15 }
  0x1b   :  { %443 = vmatprep.mubr.msk.f32.mxu0 %vm77_vm1, %v51_v12  ;;  %p507_p7 = scmp.lt.s32.totalorder %s505_s16, %s501_s1 }
  0x1c   :  { %368 = vperm.xlu0 %469, %v365_v16  }
  0x1d   :  { %p508_p8 = por %p507_p7, %p506_p6 }
  0x1e   :  { %444 = vmatmul.mubr.msk.f32.gmra.mxu0 %vm77_vm1, %v52_v15  ;;  %74 = vperm.xlu1 %470, %v56_v17  }
  0x1f   :  { %p509_p9 = pnand %p508_p8, %p502_p5 }
  0x8b   :  { %v65_v19 = vpop.permute.xlu0 %64 }
  0x8d   :  { %v60_v27 = vpop.permute.xlu1 %59 }
  0x8f   :  { %v70_v23 = vpop.permute.xlu0 %69 }
  0x91   :  { %v194_v34 = vpop.permute.xlu1 %193 }
  0x93   :  { %v189_v37 = vpop.permute.xlu0 %188 }
  0x95   :  { %v285_v43 = vpop.permute.xlu1 %284 }
  0x97   :  { %v369_v48 = vpop.permute.xlu0 %368 }
  0x99   :  { %v75_v55 = vpop.permute.xlu1 %74 }
  0xda   :  { %v442_v20 = vpop.f32.mrf.mxu0 }
  0xdb   :  { %v166_v25 = vadd.f32 %v442_v20, %v65_v19 }
  0xdc   :  { %v160_v21 = vpop.f32.mrf.mxu0 }
  0xdd   :  { %v161_v28 = vadd.f32 %v160_v21, %v60_v27 }
  0xde   :  { %v445_v22 = vpop.f32.mrf.mxu0 }
  0xdf   :  { %v179_v31 = vmul.f32 %v166_v25, %v161_v28  ;;  %v176_v57 = vadd.f32 %v445_v22, %v75_v55 }
  0xe0   :  { %v170_v24 = vpop.f32.mrf.mxu0 }
  0xe1   :  { %v171_v26 = vadd.f32 %v170_v24, %v70_v23 }
  0xe3   :  { %v181_v29 = vmul.f32 %v171_v26, %v166_v25  ;;  %v180_v30 = vmul.f32 %v171_v26, %v161_v28 }
  0xe5   :  { %446 = vmatprep.subr.mxu1 %v181_v29 }
  0xe6   :  { %447 = vmatpush3.msra.mxu1 %v181_v29 }
  0xe7   :  { %448 = vmatprep.subr.mxu1 %v180_v30 }
  0xe8   :  { %449 = vmatpush3.msra.mxu1 %v180_v30 }
  0xe9   :  { %450 = vmatprep.subr.mxu1 %v179_v31 }
  0xea   :  { %451 = vmatpush3.msra.mxu1 %v179_v31 }
  0xeb   :  { %453 = vmatmul.mubr.msk.f32.vlgmr.msra.gmra.mxu1 %vm196_vm2, %v183_v32  ;;  %455 = vmatprep.subr.mxu1 %v529_v33 }
  0xec   :  { %459 = vmatprep.mubr.msk.f32.mxu1 %vm530_vm3, %v529_v33 }
 0x1ab   :  { %v454_v35 = vpop.f32.mrf.mxu1 }
 0x1ac   :  { %v275_v36 = vadd.f32 %v454_v35, %v194_v34 }
 0x1ad   :  { %v269_v38 = vpop.f32.mrf.mxu1 }
 0x1ae   :  { %471 = vtanh.f32 %v275_v36  ;;  %v270_v39 = vadd.f32 %v269_v38, %v189_v37 }
 0x1b0   :  { %473 = vtanh.f32 %v270_v39 }
 0x1bb   :  { %v472_v40 = vpop.eup %471 }
 0x1bc   :  { %456 = vmatpush3.msk.msra.mxu1 %vm90_vm0, %v472_v40 }
 0x1bd   :  { %v474_v42 = vpop.eup %473  ;;  %457 = vmatprep.subr.mxu1 %v529_v33 }
 0x1be   :  { %458 = vmatpush3.msra.mxu1 %v474_v42 }
 0x1bf   :  { %460 = vmatmul.mubr.msk.f32.vlgmr.msra.gmra.mxu1 %vm287_vm4, %v280_v41 }
 0x27f   :  { %v360_v44 = vpop.f32.mrf.mxu1 }
 0x280   :  { %v361_v45 = vadd.f32 %v360_v44, %v285_v43 }
 0x281   :  { %v461_v46 = vpop.f32.mrf.mxu1 }
 0x282   :  { %475 = vtanh.f32 %v361_v45 }
 0x28f   :  { %v476_v47 = vpop.eup %475 }
 0x290   :  { %v371_v49 = vmul.f32 %v476_v47, %v369_v48 }
 0x292   :  { %v373_v50 = vsel %vm372_vm5, %v371_v49, 0.0 }
 0x293   :  { %v374_v51 = vrot.slane %v373_v50, 4 }
 0x295   :  { %v375_v52 = vadd.f32 %v374_v51, %v373_v50 }
 0x297   :  { %v376_v53 = vrot.slane %v375_v52, 2 }
 0x299   :  { %v377_v54 = vadd.f32 %v376_v53, %v375_v52 }
 0x29b   :  { %v378_v56 = vrot.slane %v377_v54, 1 }
 0x29d   :  { %v379_v58 = vadd.f32 %v378_v56, %v377_v54 }
 0x29f   :  { %v380_v59 = vadd.f32 %v379_v58, %v176_v57 }
 0x2a1   :  { %v412_v60 = vmul.f32 -1.442695, %v380_v59 }
 0x2a3   :  { %477 = vpow2.f32 %v412_v60 }
 0x2b0   :  { %v478_v61 = vpop.eup %477 }
 0x2b1   :  { %v384_v62 = vadd.f32 1.0, %v478_v61 }
 0x2b3   :  { %479 = vrcp.f32 %v384_v62 }
 0x2c0   :  { %v480_v63 = vpop.eup %479 }
 0x2c1   :  { %387 = vst [vmem:[#allocation5] sm:$0x1] %v480_v63 }
 0x2c2   :  { %512 = shalt.err (!%p509_p9)
}
 0x2c3   :  { %397 = dma.vmem_to_hbm [thread:$0]  %s395_s15, 16, %s648_s8, [#allocation4]  }
 0x2c4   :  { %523 = dma.done.wait [#allocation4], 16  }
 0x2c5   :  { %524 = vsyncadd [#allocation4], 4294967280 }
 0x2c6   :  { %401 = vsyncpa [#allocation3], 1 }
 0x2c7   :  { %402 = vsyncpa [#allocation4], 1 }

</bundles_post_ra>
